<compile_context>
chip_gen: v7x
topology: tpu7x:2x2x1
jax: 0.10.0
libtpu: 0.0.40
codegen_flags: <defaults>
</compile_context>

<pallas_src>
import functools

import jax
import jax.numpy as jnp
from jax.experimental import pallas as pl
from jax.experimental.pallas import tpu as pltpu


def _round_up(x, m):
    return ((x + m - 1) // m) * m


def _full_expertise_kernel(x_ref, w_ref, b_ref, v_ref, out_ref, *, res_col):
    # Stacked-annotator linear layer: (TB, dim) @ (dim, A_pad) + (1, A_pad).
    out = jnp.dot(x_ref[...], w_ref[...], preferred_element_type=jnp.float32)
    out = out + b_ref[...]                                # broadcast bias over batch
    # Padded annotator columns of w/b/v are zero, so they contribute 0 here.
    res = jnp.sum(out * v_ref[...], axis=1, keepdims=True)   # (TB, 1)
    # Pack `result` into the reserved last lane of the lane-dense output slab.
    lane = jax.lax.broadcasted_iota(jnp.int32, out.shape, 1)
    out_ref[...] = jnp.where(lane == res_col, res, out).astype(out_ref.dtype)


def full_expertise_forward(x, w, b, v, *, tile_b=None, compute_dtype=None):
    """x: (B, dim), w: (dim, A), b: (A,), v: (B, A) -> (result (B,), out (B, A)).

    compute_dtype: optionally cast x and w (e.g. jnp.bfloat16) to halve the
    dominant HBM read stream on v6e/v7x; accumulation stays f32.
    """
    B, dim = x.shape
    A = w.shape[1]

    # Lane-dense annotator axis; always reserve (at least) one extra padded
    # lane so the fused `result` column never collides with a real annotator.
    A_pad = _round_up(A + 1, 128)
    res_col = A_pad - 1

    # Batch tiling: multiple of 8 sublanes, capped so double-buffered
    # (TB, dim) + 2x(TB, A_pad) f32 tiles stay well under v7x's scoped VMEM.
    if tile_b is None:
        tile_b = min(_round_up(B, 8), 2048)
    else:
        tile_b = max(8, _round_up(tile_b, 8))
    B_pad = _round_up(B, tile_b)
    grid_b = B_pad // tile_b

    # Zero-pad: padded annotator columns contribute 0 to the reduction,
    # padded batch rows are sliced off afterwards.
    xp = jnp.pad(x, ((0, B_pad - B), (0, 0)))
    vp = jnp.pad(v, ((0, B_pad - B), (0, A_pad - A)))
    wp = jnp.pad(w, ((0, 0), (0, A_pad - A)))
    bp = jnp.pad(b.reshape(1, A), ((0, 0), (0, A_pad - A)))

    if compute_dtype is not None:
        xp = xp.astype(compute_dtype)
        wp = wp.astype(compute_dtype)

    slab = pl.pallas_call(
        functools.partial(_full_expertise_kernel, res_col=res_col),
        out_shape=jax.ShapeDtypeStruct((B_pad, A_pad), jnp.float32),
        grid=(grid_b,),
        in_specs=[
            pl.BlockSpec((tile_b, dim), lambda i: (i, 0)),    # x tile
            pl.BlockSpec((dim, A_pad), lambda i: (0, 0)),     # w (VMEM-resident)
            pl.BlockSpec((1, A_pad), lambda i: (0, 0)),       # b (VMEM-resident)
            pl.BlockSpec((tile_b, A_pad), lambda i: (i, 0)),  # v tile
        ],
        out_specs=pl.BlockSpec((tile_b, A_pad), lambda i: (i, 0)),
        compiler_params=pltpu.CompilerParams(
            # Batch tiles are independent -> shard across v7x's 2 TensorCores.
            dimension_semantics=("parallel",),
        ),
    )(xp, wp, bp, vp)

    result = slab[:B, res_col]
    out = slab[:B, :A]
    return result, out


def _reference(x, w, b, v):
    out = x @ w + b[None, :]
    return jnp.sum(out * v, axis=1), out


def _make_inputs(key, B, dim, A):
    kx, kv, kw, kb = jax.random.split(key, 4)
    x = jax.random.normal(kx, (B, dim), dtype=jnp.float32)
    v = jax.random.normal(kv, (B, A), dtype=jnp.float32)
    # Deterministic parameter init mimicking nn.Linear (uniform +- 1/sqrt(dim)),
    # per-annotator Linear(dim, 1) weights stacked into a (dim, A) matrix.
    bound = 1.0 / (dim ** 0.5)
    w = jax.random.uniform(kw, (dim, A), minval=-bound, maxval=bound, dtype=jnp.float32)
    b = jax.random.uniform(kb, (A,), minval=-bound, maxval=bound, dtype=jnp.float32)
    return x, v, w, b


if __name__ == "__main__":
    DIM = 32   # number of features
    A = 21     # annotators (module default)
    key = jax.random.PRNGKey(0)
    k1, k2 = jax.random.split(key)

    # 1) Small config consistent with the module's forward (single tile).
    #    NOTE: at this size a standalone pallas_call is launch-overhead
    #    dominated; the design only pays off at large effective batch.
    x, v, w, b = _make_inputs(k1, 8, DIM, A)
    result, out = full_expertise_forward(x, w, b, v)
    jax.block_until_ready((result, out))
    ref_result, ref_out = _reference(x, w, b, v)
    assert jnp.allclose(out, ref_out, atol=1e-5, rtol=1e-5)
    assert jnp.allclose(result, ref_result, atol=1e-5, rtol=1e-5)

    # 2) Exercise the batch-tiled grid (grid > 1) with a ragged final tile.
    x2, v2, w2, b2 = _make_inputs(k2, 20, DIM, A)
    result2, out2 = full_expertise_forward(x2, w2, b2, v2, tile_b=8)
    jax.block_until_ready((result2, out2))
    ref_result2, ref_out2 = _reference(x2, w2, b2, v2)
    assert jnp.allclose(out2, ref_out2, atol=1e-5, rtol=1e-5)
    assert jnp.allclose(result2, ref_result2, atol=1e-5, rtol=1e-5)

    print("KERNEL_OK")
</pallas_src>

<mosaic_0001>
module attributes {stable_mosaic.version = 11 : i64} {
  func.func @_full_expertise_kernel(%arg0: i32, %arg1: memref<8x32xf32, #tpu.memory_space<vmem>>, %arg2: memref<32x128xf32, #tpu.memory_space<vmem>>, %arg3: memref<1x128xf32, #tpu.memory_space<vmem>>, %arg4: memref<8x128xf32, #tpu.memory_space<vmem>>, %arg5: memref<8x128xf32, #tpu.memory_space<vmem>>) attributes {dimension_semantics = [#tpu.dimension_semantics<parallel>], iteration_bounds = array<i64: 1>, scalar_prefetch = 0 : i64, scratch_operands = 0 : i64, tpu.core_type = #tpu.core_type<tc>, window_params = [{transform_indices = @transform_0, window_bounds = array<i64: 8, 32>}, {pipeline_mode = #tpu.pipeline_mode<synchronous>, transform_indices = @transform_1, window_bounds = array<i64: 32, 128>}, {pipeline_mode = #tpu.pipeline_mode<synchronous>, transform_indices = @transform_2, window_bounds = array<i64: 1, 128>}, {transform_indices = @transform_3, window_bounds = array<i64: 8, 128>}, {transform_indices = @transform_4, window_bounds = array<i64: 8, 128>}]} {
    %c0 = arith.constant 0 : index
    %c0_0 = arith.constant 0 : index
    %0 = vector.load %arg1[%c0, %c0_0] : memref<8x32xf32, #tpu.memory_space<vmem>>, vector<8x32xf32>
    %c0_1 = arith.constant 0 : index
    %c0_2 = arith.constant 0 : index
    %1 = vector.load %arg2[%c0_1, %c0_2] : memref<32x128xf32, #tpu.memory_space<vmem>>, vector<32x128xf32>
    %cst = arith.constant dense<0.000000e+00> : vector<8x128xf32>
    %2 = tpu.matmul %0, %1, %cst {dimension_numbers = #tpu.dot_dimension_numbers<[1], [0], [0], [1], [0, 0, 1, 1], [], []>} : vector<8x32xf32>, vector<32x128xf32>, vector<8x128xf32> -> vector<8x128xf32>
    %c0_3 = arith.constant 0 : index
    %c0_4 = arith.constant 0 : index
    %3 = vector.load %arg3[%c0_3, %c0_4] : memref<1x128xf32, #tpu.memory_space<vmem>>, vector<1x128xf32>
    %4 = vector.broadcast %3 : vector<1x128xf32> to vector<8x128xf32>
    %5 = arith.addf %2, %4 : vector<8x128xf32>
    %c0_5 = arith.constant 0 : index
    %c0_6 = arith.constant 0 : index
    %6 = vector.load %arg4[%c0_5, %c0_6] : memref<8x128xf32, #tpu.memory_space<vmem>>, vector<8x128xf32>
    %7 = arith.mulf %5, %6 : vector<8x128xf32>
    %cst_7 = arith.constant dense<0.000000e+00> : vector<8xf32>
    %8 = vector.multi_reduction <add>, %7, %cst_7 [1] : vector<8x128xf32> to vector<8xf32>
    %9 = vector.shape_cast %8 : vector<8xf32> to vector<8x1xf32>
    %10 = tpu.iota {dimensions = array<i32: 1>} : vector<8x128xi32>
    %c127_i32 = arith.constant 127 : i32
    %11 = vector.broadcast %c127_i32 : i32 to vector<8x128xi32>
    %12 = arith.cmpi eq, %10, %11 : vector<8x128xi32>
    %13 = vector.shape_cast %9 : vector<8x1xf32> to vector<8x1xf32>
    %14 = vector.broadcast %13 : vector<8x1xf32> to vector<8x128xf32>
    %15 = arith.select %12, %14, %5 : vector<8x128xi1>, vector<8x128xf32>
    %c0_8 = arith.constant 0 : index
    %c0_9 = arith.constant 0 : index
    %16 = vector.load %arg5[%c0_8, %c0_9] : memref<8x128xf32, #tpu.memory_space<vmem>>, vector<8x128xf32>
    tpu.vector_store %arg5[%c0_8, %c0_9], %15 {strides = array<i32>} : memref<8x128xf32, #tpu.memory_space<vmem>>, vector<8x128xf32>,
    return
  }
  func.func @transform_0(%arg0: i32) -> (i32, i32) {
    %c0_i32 = arith.constant 0 : i32
    %c0_i32_0 = arith.constant 0 : i32
    return %arg0, %c0_i32 : i32, i32
  }
  func.func @transform_1(%arg0: i32) -> (i32, i32) {
    %c0_i32 = arith.constant 0 : i32
    %c0_i32_0 = arith.constant 0 : i32
    %c0_i32_1 = arith.constant 0 : i32
    return %c0_i32, %c0_i32_0 : i32, i32
  }
  func.func @transform_2(%arg0: i32) -> (i32, i32) {
    %c0_i32 = arith.constant 0 : i32
    %c0_i32_0 = arith.constant 0 : i32
    %c0_i32_1 = arith.constant 0 : i32
    return %c0_i32, %c0_i32_0 : i32, i32
  }
  func.func @transform_3(%arg0: i32) -> (i32, i32) {
    %c0_i32 = arith.constant 0 : i32
    %c0_i32_0 = arith.constant 0 : i32
    return %arg0, %c0_i32 : i32, i32
  }
  func.func @transform_4(%arg0: i32) -> (i32, i32) {
    %c0_i32 = arith.constant 0 : i32
    %c0_i32_0 = arith.constant 0 : i32
    return %arg0, %c0_i32 : i32, i32
  }
}

</mosaic_0001>

<bundles_post_ra>
// kernel: tpu_custom_call.1
= control target key start
LH: loop header
LB: loop body
LE: loop exit
PB: predicated region body
PF: predicated region fallthrough
CT: control target
= control target key end

     0   :  { %9 = vsyncpa [#allocation3], 0  ;;  %s341_s0 = inlined_call_operand.hbm [shape: f32[8,32], index: 0, kind: input, shape index: {}]   ;;  %s342_s1 = inlined_call_operand.hbm [shape: f32[32,128], index: 1, kind: input, shape index: {}]   ;;  %s343_s2 = inlined_call_operand.vmem [shape: f32[1,128], index: 2, kind: input, shape index: {}]   ;;  %s344_s3 = inlined_call_operand.vmem [shape: f32[8,128], index: 3, kind: input, shape index: {}]   ;;  %s345_s4 = inlined_call_operand.hbm [shape: f32[8,128], index: 4, kind: output, shape index: {}]  }
   0x1   :  { %10 = vsyncpa [#allocation6], 0 }
   0x2   :  { %11 = vsyncpa [#allocation4], 0  ;;  %s259_s15 = smov [#allocation2]   ;;  %s260_s17 = smov [#allocation5]  }
   0x3   :  { %s18_s16 = sshll.u32 %s259_s15, 4  ;;  %s27_s18 = sshll.u32 %s260_s17, 4  ;;  %s19_s16 = int_to_ptr.vmem [resolvable:$true] %s18_s16  ;;  %s292_s18 = int_to_ptr.vmem [resolvable:$true] %s27_s18 }
   0x4   :  { %s187_s21 = scalar_lea.hbm %s341_s0, 128 }
   0x5   :  { %p188_p0 = scmp.ne.s32.totalorder %s341_s0, %s187_s21  ;;  %p191_p1 = scmp.lt.u32.totalorder %s187_s21, %s341_s0 }
   0x7   :  { %p193_p2 = pnand %p191_p1, %p188_p0 }
   0x9   :  { %196 = shalt.err (!%p193_p2)
}
   0xa   :  { %s197_s26 = scalar_lea.vmem %s19_s16, 128  ;;  %p202_p4 = scmp.lt.s32.totalorder %s19_s16, %s19_s16 }
   0xb   :  { %p198_p3 = scmp.ne.s32.totalorder %s19_s16, %s197_s26  ;;  %p203_p5 = scmp.lt.s32.totalorder %s197_s26, %s197_s26 }
   0xd   :  { %p204_p6 = por %p203_p5, %p202_p4 }
   0xf   :  { %p205_p7 = pnand %p204_p6, %p198_p3 }
  0x11   :  { %208 = shalt.err (!%p205_p7)
}
  0x12   :  { %21 = dma.hbm_to_vmem [thread:$0]  %s341_s0, 128, %s19_s16, [#allocation3]  }
  0x13   :  { %s209_s5 = scalar_lea.hbm %s342_s1, 512 }
  0x14   :  { %p210_p8 = scmp.ne.s32.totalorder %s342_s1, %s209_s5  ;;  %p213_p9 = scmp.lt.u32.totalorder %s209_s5, %s342_s1 }
  0x16   :  { %p215_p10 = pnand %p213_p9, %p210_p8 }
  0x18   :  { %218 = shalt.err (!%p215_p10)
}
  0x19   :  { %s219_s10 = scalar_lea.vmem %s292_s18, 512  ;;  %p224_p12 = scmp.lt.s32.totalorder %s292_s18, %s292_s18 }
  0x1a   :  { %p220_p11 = scmp.ne.s32.totalorder %s292_s18, %s219_s10  ;;  %p225_p13 = scmp.lt.s32.totalorder %s219_s10, %s219_s10 }
  0x1c   :  { %p226_p0 = por %p225_p13, %p224_p12 }
  0x1e   :  { %p227_p1 = pnand %p226_p0, %p220_p11 }
  0x20   :  { %230 = shalt.err (!%p227_p1)
}
  0x21   :  { %s261_s0 = smov 128   ;;  %s262_s11 = smov 8  }
  0x22   :  { %33 = dma.hbm_to_vmem [thread:$0]  %s342_s1, 512, %s292_s18, [#allocation6], %s261_s0, %s261_s0, %s262_s11  }
  0x23   :  { %253 = dma.done.wait [#allocation3], 128  }
  0x24   :  { %254 = vsyncadd [#allocation3], 4294967168 }
  0x25   :  { %255 = dma.done.wait [#allocation6], 512  }
  0x26   :  { %256 = vsyncadd [#allocation6], 4294966784  ;;  %v263_v0 = vmov 0.0|0.0   ;;  %vm264_vm0 = vmmov 0   ;;  %v265_v1 = vmov 0.0   ;;  %v45_v2 = vld [vmem:[#allocation5] sm:$0xff]  ;;  %v134_v15 = vlaneseq }
  0x27   :  { %173 = vmatprep.subr.bf16.mxu0 %v263_v0  ;;  %170 = vmatprep.mubr.msk.f32.mxu0 %vm264_vm0, %v265_v1  ;;  %v46_v3 = vld [vmem:[#allocation5 + $0x8] sm:$0xff]  ;;  %v47_v4 = vld [vmem:[#allocation5 + $0x10] sm:$0xff]  ;;  %v48_v6 = vld [vmem:[#allocation5 + $0x18] sm:$0xff]  ;;  %vm56_vm1 = vcmask 261120   ;;  %s266_s17 = smov [#allocation7]  }
  0x28   :  { %v174_v5 = vpack.c.bf16 %v46_v3, %v45_v2  ;;  %v177_v7 = vpack.c.bf16 %v48_v6, %v47_v4  ;;  %v44_v8 = vld [vmem:[#allocation2] sm:$0xff]  ;;  %v135_v16 = vand.u32 127, %v134_v15  ;;  %s145_s18 = sshll.u32 %s266_s17, 4  ;;  %s146_s18 = int_to_ptr.vmem [resolvable:$true] %s145_s18 }
  0x29   :  { %v155_v9 = vld [vmem:[%s343_s2] ss:$0 sm:$0xff]  ;;  %s231_s19 = scalar_lea.vmem %s146_s18, 128  ;;  %p236_p3 = scmp.lt.s32.totalorder %s146_s18, %s146_s18 }
  0x2a   :  { %175 = vmatpush3.bf16.msra.mxu0 %v174_v5  ;;  %v130_v11 = vld [vmem:[%s344_s3] sm:$0xff]  ;;  %vm136_vm2 = vcmp.eq.s32.totalorder %v135_v16, 127  ;;  %p232_p2 = scmp.ne.s32.totalorder %s146_s18, %s231_s19  ;;  %p237_p4 = scmp.lt.s32.totalorder %s231_s19, %s231_s19 }
  0x2b   :  { %176 = vmatprep.subr.bf16.mxu0 %v263_v0 }
  0x2c   :  { %p238_p5 = por %p237_p4, %p236_p3 }
  0x2e   :  { %178 = vmatpush3.bf16.msra.mxu0 %v177_v7  ;;  %p239_p6 = pnand %p238_p5, %p232_p2 }
  0x31   :  { %171 = vmatmul.mubr.msk.f32.vlgmr.msra.gmra.mrb[0].mxu0 %vm56_vm1, %v44_v8 }
 0x104   :  { %v126_v10 = vpop.f32.mrb[0].mxu0 }
 0x105   :  { %v127_v12 = vadd.f32 %v155_v9, %v126_v10  ;;  %v172_v13 = vpop.f32.mrb[1].mxu0 }
 0x107   :  { %v131_v14 = vmul.f32 %v130_v11, %v127_v12 }
 0x109   :  { %132 = vadd.xlane.f32.xlu0 %v131_v14 }
 0x196   :  { %v133_v17 = vpop.xlane.xlu0 %132 }
 0x197   :  { %v137_v18 = vsel %vm136_vm2, %v133_v17, %v127_v12 }
 0x198   :  { %138 = vst [vmem:[#allocation7] sm:$0xff] %v137_v18 }
 0x199   :  { %242 = shalt.err (!%p239_p6)
}
 0x19a   :  { %s243_s20 = scalar_lea.hbm %s345_s4, 128 }
 0x19b   :  { %p244_p7 = scmp.ne.s32.totalorder %s345_s4, %s243_s20  ;;  %p247_p8 = scmp.lt.u32.totalorder %s243_s20, %s345_s4 }
 0x19d   :  { %p249_p9 = pnand %p247_p8, %p244_p7 }
 0x19f   :  { %252 = shalt.err (!%p249_p9)
}
 0x1a0   :  { %148 = dma.vmem_to_hbm [thread:$0]  %s146_s18, 128, %s345_s4, [#allocation4]  }
 0x1a1   :  { %257 = dma.done.wait [#allocation4], 128  }
 0x1a2   :  { %258 = vsyncadd [#allocation4], 4294967168 }
 0x1a3   :  { %152 = vsyncpa [#allocation3], 1 }
 0x1a4   :  { %153 = vsyncpa [#allocation6], 1 }
 0x1a5   :  { %154 = vsyncpa [#allocation4], 1 }

</bundles_post_ra>
